<compile_context>
chip_gen: v5e
topology: v5e:2x2
jax: 0.10.0
libtpu: 0.0.40
codegen_flags: <defaults>
</compile_context>

<pallas_src>
import jax
import jax.numpy as jnp
from jax.experimental import pallas as pl
from jax.experimental.pallas import tpu as pltpu


def pooler_kernel(x_ref, w_ref, b_ref, o_ref):
    # x_ref: [B, H_in]    CLS rows, already in compute dtype (resident across N-tiles)
    # w_ref: [H_in, tn]   pre-transposed weight tile, compute dtype (no in-kernel cast)
    # b_ref: [1, tn]      f32 bias slice
    # o_ref: [B, tn]
    y = jnp.dot(x_ref[...], w_ref[...], preferred_element_type=jnp.float32)  # MXU, f32 acc
    y = y + b_ref[...].astype(jnp.float32)          # broadcast over batch (f32, VPU)
    o_ref[...] = jnp.tanh(y).astype(o_ref.dtype)    # f32 tanh on EUP, then downcast


def prepare_pooler_params(weight, bias, compute_dtype=jnp.bfloat16):
    """One-time parameter prep (call at init / checkpoint load, NOT per forward).

    weight: [H_out, H_in] PyTorch nn.Linear layout.
    Returns (weight_t, bias_2d): [H_in, H_out] compute-dtype weight (MXU-ready,
    no per-call transpose or cast) and [1, H_out] f32 bias.
    """
    weight_t = jnp.asarray(weight).T.astype(compute_dtype)
    bias_2d = jnp.asarray(bias).astype(jnp.float32).reshape(1, -1)
    return weight_t, bias_2d


def _tpu_generation_info():
    """Best-effort (num_tensorcores, per-core VMEM capacity bytes); safe fallbacks."""
    num_tc = 1
    vmem_cap = 64 * 1024 * 1024
    try:
        kind = jax.devices()[0].device_kind.lower()
        if "v7" in kind:
            num_tc = 2
    except Exception:
        pass
    try:
        cap = getattr(pltpu.get_tpu_info(), "vmem_capacity_bytes", None)
        if cap:
            vmem_cap = int(cap)
    except Exception:
        pass
    return num_tc, vmem_cap


def _select_tile_n(H, num_tc):
    """Output-H tile size."""
    if H % 128 != 0:
        return H                     # ragged / tiny H (demo shape): one full block
    if num_tc >= 2 and H >= 256:
        # v7x: balanced lane-aligned 2-way split across the two TensorCores
        # (H=768 -> 384, H=1024 -> 512).  Balance beats 256-alignment because
        # the kernel is weight-DMA bound, not MXU bound.
        return min(H, ((pl.cdiv(H, 2) + 127) // 128) * 128)
    # Single TC (v5e/v6e): one block; pipelining hides nothing and each extra
    # grid step costs ~0.35us.  Only tile when the weight gets large.
    return H if H <= 2048 else 1024


def pooler_forward(hidden_states, weight_t, bias_2d, *, compute_dtype=jnp.bfloat16):
    """TVLT Pooler forward: tanh(hidden_states[:, 0] @ W.T + b).

    hidden_states: [B, S, H]
    weight_t:      [H, H]  pre-transposed [in, out] (see prepare_pooler_params)
    bias_2d:       [1, H]  f32
    returns:       [B, H] in hidden_states.dtype
    """
    B, S, H = hidden_states.shape
    h_in, h_out = weight_t.shape
    assert h_in == H and h_out == H and bias_2d.shape == (1, H)

    # Only the CLS rows cross HBM (B*H bytes, not B*S*H); operand cast happens
    # once in the wrapper so the kernel body has no per-step casts.
    x0 = hidden_states[:, 0, :].astype(compute_dtype)           # [B, H]
    w = weight_t if weight_t.dtype == compute_dtype else weight_t.astype(compute_dtype)

    num_tc, vmem_cap = _tpu_generation_info()
    tn = _select_tile_n(H, num_tc)
    grid = (pl.cdiv(H, tn),)

    out_dtype = hidden_states.dtype
    x_b = jnp.dtype(x0.dtype).itemsize
    w_b = jnp.dtype(w.dtype).itemsize
    o_b = jnp.dtype(out_dtype).itemsize

    # x block is resident (same block every step); weight/bias/out are double-buffered.
    tile_bytes = (B * H * x_b
                  + 2 * (H * tn * w_b + tn * 4 + B * tn * o_b)
                  + B * tn * 4)
    vmem_limit = int(min(max(2 * tile_bytes, 4 * 1024 * 1024), vmem_cap // 2))

    cost = pl.CostEstimate(
        flops=2 * B * H * H,
        transcendentals=B * H,
        bytes_accessed=B * H * x_b + H * H * w_b + H * 4 + B * H * o_b,
    )

    return pl.pallas_call(
        pooler_kernel,
        out_shape=jax.ShapeDtypeStruct((B, H), out_dtype),
        grid=grid,
        in_specs=[
            pl.BlockSpec((B, H), lambda j: (0, 0)),     # CLS rows: same block every N-tile
            pl.BlockSpec((H, tn), lambda j: (0, j)),    # pre-transposed weight columns
            pl.BlockSpec((1, tn), lambda j: (0, j)),    # bias slice
        ],
        out_specs=pl.BlockSpec((B, tn), lambda j: (0, j)),
        compiler_params=pltpu.CompilerParams(
            dimension_semantics=("parallel",),          # v7x: shard N-tiles across both TCs
            vmem_limit_bytes=vmem_limit,
        ),
        cost_estimate=cost,
    )(x0, w, bias_2d)


if __name__ == "__main__":
    key = jax.random.PRNGKey(0)
    k_x, k_w, k_b = jax.random.split(key, 3)

    B, S, H = 2, 8, 32  # batch, seq, hidden_size

    hidden_states = jax.random.normal(k_x, (B, S, H), dtype=jnp.float32)
    # Synthetic nn.Linear(hidden_size, hidden_size) parameters (PyTorch [out, in] layout).
    weight = jax.random.normal(k_w, (H, H), dtype=jnp.float32) * 0.02
    bias = jax.random.normal(k_b, (H,), dtype=jnp.float32) * 0.02

    # One-time parameter prep (transpose + bf16 cast live in HBM thereafter).
    weight_t, bias_2d = prepare_pooler_params(weight, bias)

    out = pooler_forward(hidden_states, weight_t, bias_2d)
    out = jax.block_until_ready(out)

    # Reference matching the kernel's compute path (bf16 operands, f32 accumulate).
    x0 = hidden_states[:, 0]
    ref_bf16 = jnp.tanh(
        jnp.dot(x0.astype(jnp.bfloat16), weight.T.astype(jnp.bfloat16),
                preferred_element_type=jnp.float32) + bias)
    # Pure-f32 reference of the exact PyTorch semantics.
    ref_f32 = jnp.tanh(x0 @ weight.T + bias)

    assert out.shape == (B, H)
    assert jnp.allclose(out, ref_bf16, atol=1e-3, rtol=1e-3), "mismatch vs bf16 reference"
    assert jnp.allclose(out, ref_f32, atol=2e-2, rtol=2e-2), "mismatch vs f32 reference"

    print("KERNEL_OK")
</pallas_src>

<mosaic_0001>
module attributes {stable_mosaic.version = 11 : i64} {
  func.func @pooler_kernel(%arg0: i32, %arg1: memref<2x32xbf16, #tpu.memory_space<vmem>>, %arg2: memref<32x32xbf16, #tpu.memory_space<vmem>>, %arg3: memref<1x32xf32, #tpu.memory_space<vmem>>, %arg4: memref<2x32xf32, #tpu.memory_space<vmem>>) attributes {dimension_semantics = [#tpu.dimension_semantics<parallel>], iteration_bounds = array<i64: 1>, scalar_prefetch = 0 : i64, scratch_operands = 0 : i64, tpu.core_type = #tpu.core_type<tc>, window_params = [{pipeline_mode = #tpu.pipeline_mode<synchronous>, transform_indices = @transform_0, window_bounds = array<i64: 2, 32>}, {transform_indices = @transform_1, window_bounds = array<i64: 32, 32>}, {transform_indices = @transform_2, window_bounds = array<i64: 1, 32>}, {transform_indices = @transform_3, window_bounds = array<i64: 2, 32>}]} {
    %c0 = arith.constant 0 : index
    %c0_0 = arith.constant 0 : index
    %0 = vector.load %arg1[%c0, %c0_0] : memref<2x32xbf16, #tpu.memory_space<vmem>>, vector<2x32xbf16>
    %c0_1 = arith.constant 0 : index
    %c0_2 = arith.constant 0 : index
    %1 = vector.load %arg2[%c0_1, %c0_2] : memref<32x32xbf16, #tpu.memory_space<vmem>>, vector<32x32xbf16>
    %cst = arith.constant dense<0.000000e+00> : vector<2x32xf32>
    %2 = tpu.matmul %0, %1, %cst {dimension_numbers = #tpu.dot_dimension_numbers<[1], [0], [0], [1], [0, 0, 1, 1], [], []>} : vector<2x32xbf16>, vector<32x32xbf16>, vector<2x32xf32> -> vector<2x32xf32>
    %c0_3 = arith.constant 0 : index
    %c0_4 = arith.constant 0 : index
    %3 = vector.load %arg3[%c0_3, %c0_4] : memref<1x32xf32, #tpu.memory_space<vmem>>, vector<1x32xf32>
    %4 = vector.broadcast %3 : vector<1x32xf32> to vector<2x32xf32>
    %5 = arith.addf %2, %4 : vector<2x32xf32>
    %6 = math.tanh %5 : vector<2x32xf32>
    %c0_5 = arith.constant 0 : index
    %c0_6 = arith.constant 0 : index
    %7 = vector.load %arg4[%c0_5, %c0_6] : memref<2x32xf32, #tpu.memory_space<vmem>>, vector<2x32xf32>
    tpu.vector_store %arg4[%c0_5, %c0_6], %6 {strides = array<i32>} : memref<2x32xf32, #tpu.memory_space<vmem>>, vector<2x32xf32>,
    return
  }
  func.func @transform_0(%arg0: i32) -> (i32, i32) {
    %c0_i32 = arith.constant 0 : i32
    %c0_i32_0 = arith.constant 0 : i32
    %c0_i32_1 = arith.constant 0 : i32
    return %c0_i32, %c0_i32_0 : i32, i32
  }
  func.func @transform_1(%arg0: i32) -> (i32, i32) {
    %c0_i32 = arith.constant 0 : i32
    %c0_i32_0 = arith.constant 0 : i32
    return %c0_i32, %arg0 : i32, i32
  }
  func.func @transform_2(%arg0: i32) -> (i32, i32) {
    %c0_i32 = arith.constant 0 : i32
    %c0_i32_0 = arith.constant 0 : i32
    return %c0_i32, %arg0 : i32, i32
  }
  func.func @transform_3(%arg0: i32) -> (i32, i32) {
    %c0_i32 = arith.constant 0 : i32
    %c0_i32_0 = arith.constant 0 : i32
    return %c0_i32, %arg0 : i32, i32
  }
}

</mosaic_0001>

<bundles_post_ra>
// kernel: tpu_custom_call.1
= control target key start
LH: loop header
LB: loop body
LE: loop exit
PB: predicated region body
PF: predicated region fallthrough
CT: control target
= control target key end

     0   :  { %8 = vsyncpa [#allocation3], 0  ;;  %s239_s0 = inlined_call_operand.hbm [shape: bf16[2,32], index: 0, kind: input, shape index: {}]   ;;  %s240_s1 = inlined_call_operand.hbm [shape: bf16[32,32], index: 1, kind: input, shape index: {}]   ;;  %s241_s2 = inlined_call_operand.vmem [shape: f32[1,32], index: 2, kind: input, shape index: {}]   ;;  %s242_s3 = inlined_call_operand.hbm [shape: f32[2,32], index: 3, kind: output, shape index: {}]  }
   0x1   :  { %9 = vsyncpa [#allocation6], 0 }
   0x2   :  { %10 = vsyncpa [#allocation4], 0  ;;  %s16_s14 = sshll.u32 %s239_s0, 4  ;;  %s202_s15 = smov [#allocation2]   ;;  %s17_s14 = int_to_ptr.hbm [resolvable:$true] %s16_s14 }
   0x3   :  { %s18_s16 = sshll.u32 %s202_s15, 4  ;;  %s26_s19 = sshll.u32 %s240_s1, 4  ;;  %s19_s16 = int_to_ptr.vmem [resolvable:$true] %s18_s16  ;;  %s27_s19 = int_to_ptr.hbm [resolvable:$true] %s26_s19 }
   0x4   :  { %21 = dma.hbm_to_vmem [thread:$0]  %s17_s14, 16, %s19_s16, [#allocation3]  }
   0x5   :  { %s203_s20 = smov [#allocation5]   ;;  %s204_s22 = smov 64  }
   0x6   :  { %s28_s21 = sshll.u32 %s203_s20, 4  ;;  %s205_s23 = smov 4   ;;  %s29_s21 = int_to_ptr.vmem [resolvable:$true] %s28_s21 }
   0x7   :  { %34 = dma.hbm_to_vmem [thread:$0]  %s27_s19, 256, %s29_s21, [#allocation6], %s204_s22, %s204_s22, %s205_s23  }
   0x8   :  { %196 = dma.done.wait [#allocation3], 16  }
   0x9   :  { %197 = vsyncadd [#allocation3], 4294967280 }
   0xa   :  { %198 = dma.done.wait [#allocation6], 256  }
   0xb   :  { %199 = vsyncadd [#allocation6], 4294967040  ;;  %v115_v0 = vld [vmem:[#allocation5 + $0x8] sm:$0xff]  ;;  %v114_v1 = vld [vmem:[#allocation5] sm:$0xff]  ;;  %vm67_vm0 = vcmask 261120   ;;  %s206_s24 = smov [#allocation7]  }
   0xc   :  { %77 = vmatpush.bf16.msra.mxu0 %v115_v0  ;;  %v46_v2 = vld [vmem:[#allocation2] sm:$0x1]  ;;  %s92_s25 = sshll.u32 %s206_s24, 4  ;;  %s94_s28 = sshll.u32 %s242_s3, 4  ;;  %vm85_vm1 = vcmask 254976   ;;  %s93_s25 = int_to_ptr.vmem [resolvable:$true] %s92_s25  ;;  %s95_s28 = int_to_ptr.hbm [resolvable:$true] %s94_s28 }
   0xd   :  { %v121_v3 = vld [vmem:[%s241_s2] ss:$0 sm:$0xff] }
  0x10   :  { %78 = vmatpush.bf16.msra.mxu0 %v114_v1 }
  0x13   :  { %113 = vmatmul.msk.bf16.vlgmr.msra.gmra.mxu0 %vm67_vm0, %v46_v2 }
  0x90   :  { %v80_v4 = vpop.f32.mrf.mxu0 }
  0x91   :  { %v81_v5 = vadd.f32 %v121_v3, %v80_v4 }
  0x93   :  { %122 = vtanh.f32 %v81_v5 }
  0x98   :  { %v82_v6 = vpop.f32.mrf.mxu0 }
  0x99   :  { %v123_v7 = vpop.eup %122 }
  0x9a   :  { %86 = vst.msk [vmem:[#allocation7] sm:$0x3] %vm85_vm1, %v123_v7 }
  0x9b   :  { %97 = dma.vmem_to_hbm [thread:$0]  %s93_s25, 32, %s95_s28, [#allocation4]  }
  0x9c   :  { %200 = dma.done.wait [#allocation4], 32  }
  0x9d   :  { %201 = vsyncadd [#allocation4], 4294967264 }
  0x9e   :  { %102 = vsyncpa [#allocation3], 1 }
  0x9f   :  { %103 = vsyncpa [#allocation6], 1 }
  0xa0   :  { %104 = vsyncpa [#allocation4], 1 }

</bundles_post_ra>
